<compile_context>
chip_gen: v7x
topology: tpu7x:2x2x1
jax: 0.10.0
libtpu: 0.0.40
codegen_flags: <defaults>
</compile_context>

<pallas_src>
import functools

import jax
import jax.numpy as jnp
import numpy as np
from jax.experimental import pallas as pl
from jax.experimental.pallas import tpu as pltpu

BN_EPS = 1e-5
LANE = 128


def _round_up(x, m):
    return (x + m - 1) // m * m


# --------------------------------------------------------------------------
# Kernel
# --------------------------------------------------------------------------
def gin_hsp_kernel(x_ref, adj_ref,
                   w1_ref, b1_ref, g1_ref, be1_ref,
                   w2_ref, b2_ref, g2_ref, be2_ref,
                   out_ref, *, eps, n_real):
    """Full GIN_HSP forward on one (padded) graph.

    x_ref   : VMEM [Np, Ip]  bf16 node embeddings (zero padded)
    adj_ref : VMEM [Np, Np]  bf16 combined adjacency (hop coefs pre-folded)
    w*_ref  : VMEM bf16 Linear weights; b*/g*/be* f32 bias / BN gamma / beta
    out_ref : VMEM [Np, Op]  f32 output (lane-dense last dim)
    """
    # ---- inside_aggr='sum' + outside_aggr='weight' collapsed to ONE matmul
    agg = jnp.dot(adj_ref[...], x_ref[...], preferred_element_type=jnp.float32)
    h = (eps + 1.0) * x_ref[...].astype(jnp.float32) + agg

    # Row mask so BatchNorm (training mode) statistics only see real nodes.
    rows = jax.lax.broadcasted_iota(jnp.int32, (h.shape[0], 1), 0)
    mask = (rows < n_real).astype(jnp.float32)
    inv_n = 1.0 / float(n_real)

    def lin_bn_relu(v_f32, w_ref, b_ref, g_ref, be_ref):
        # Linear: bf16 inputs, f32 accumulation on the MXU.
        y = jnp.dot(v_f32.astype(w_ref.dtype), w_ref[...],
                    preferred_element_type=jnp.float32) + b_ref[...]
        # BatchNorm1d (training mode, biased variance) over real node rows.
        m = jnp.sum(y * mask, axis=0, keepdims=True) * inv_n
        c = (y - m) * mask
        var = jnp.sum(c * c, axis=0, keepdims=True) * inv_n
        y = (y - m) * jax.lax.rsqrt(var + BN_EPS) * g_ref[...] + be_ref[...]
        return jnp.maximum(y, 0.0)

    h1 = lin_bn_relu(h, w1_ref, b1_ref, g1_ref, be1_ref)
    h2 = lin_bn_relu(h1, w2_ref, b2_ref, g2_ref, be2_ref)
    out_ref[...] = h2


# --------------------------------------------------------------------------
# Wrapper
# --------------------------------------------------------------------------
def build_combined_adj(edge_index, edge_weights, hop_coef, max_distance, n_pad):
    """A[src, dst] += softmax(hop_coef)[d-1] for every edge with SP length d.

    Equivalent to sum_d coef[d] * (dense COO adjacency of hop d), with
    duplicate edges summed — matches torch.sparse.mm + weighted hop sum.
    """
    coef = jax.nn.softmax(hop_coef, axis=0)
    src, dst = edge_index[0], edge_index[1]
    valid = (edge_weights >= 1) & (edge_weights <= max_distance)
    d = jnp.clip(edge_weights - 1, 0, max_distance - 1)
    vals = jnp.where(valid, coef[d], 0.0)
    adj = jnp.zeros((n_pad, n_pad), jnp.float32)
    return adj.at[jnp.where(valid, src, 0), jnp.where(valid, dst, 0)].add(vals)


def gin_hsp_layer(node_embeddings, edge_index, edge_weights, params, *,
                  max_distance, eps=0.0, matmul_dtype=jnp.bfloat16):
    n, i = node_embeddings.shape
    o = params["w1"].shape[1]
    n_pad = max(_round_up(n, LANE), LANE)
    i_pad = max(_round_up(i, LANE), LANE)
    o_pad = max(_round_up(o, LANE), LANE)

    # Combined, coefficient-folded adjacency built directly at padded size.
    adj = build_combined_adj(edge_index, edge_weights, params["hop_coef"],
                             max_distance, n_pad).astype(matmul_dtype)
    x = jnp.pad(node_embeddings,
                ((0, n_pad - n), (0, i_pad - i))).astype(matmul_dtype)

    def pad2(a, r, c):
        return jnp.pad(a, ((0, r - a.shape[0]), (0, c - a.shape[1])))

    w1 = pad2(params["w1"], i_pad, o_pad).astype(matmul_dtype)
    w2 = pad2(params["w2"], o_pad, o_pad).astype(matmul_dtype)
    b1 = pad2(params["b1"], 1, o_pad)
    g1 = pad2(params["g1"], 1, o_pad)     # padded gamma = 0 -> padded cols stay 0
    be1 = pad2(params["be1"], 1, o_pad)
    b2 = pad2(params["b2"], 1, o_pad)
    g2 = pad2(params["g2"], 1, o_pad)
    be2 = pad2(params["be2"], 1, o_pad)

    vmem = lambda: pl.BlockSpec(memory_space=pltpu.MemorySpace.VMEM)
    kernel = functools.partial(gin_hsp_kernel, eps=eps, n_real=n)

    out = pl.pallas_call(
        kernel,
        out_shape=jax.ShapeDtypeStruct((n_pad, o_pad), jnp.float32),
        in_specs=[vmem() for _ in range(10)],
        out_specs=vmem(),
    )(x, adj, w1, b1, g1, be1, w2, b2, g2, be2)

    return out[:n, :o]


# --------------------------------------------------------------------------
# Pure-JAX reference (mirrors the kernel's dtype strategy: bf16 matmul inputs,
# f32 accumulation/elementwise — same math as the PyTorch forward otherwise).
# --------------------------------------------------------------------------
def ref_forward(node_embeddings, edge_index, edge_weights, params, *,
                max_distance, eps=0.0, matmul_dtype=jnp.bfloat16):
    n, _ = node_embeddings.shape
    coef = jax.nn.softmax(params["hop_coef"], axis=0)
    src, dst = edge_index[0], edge_index[1]
    valid = (edge_weights >= 1) & (edge_weights <= max_distance)
    d = jnp.clip(edge_weights - 1, 0, max_distance - 1)
    vals = jnp.where(valid, coef[d], 0.0)
    adj = jnp.zeros((n, n), jnp.float32).at[
        jnp.where(valid, src, 0), jnp.where(valid, dst, 0)].add(vals)

    adj = adj.astype(matmul_dtype)
    x = node_embeddings.astype(matmul_dtype)
    agg = jnp.dot(adj, x, preferred_element_type=jnp.float32)
    h = (eps + 1.0) * x.astype(jnp.float32) + agg

    def lin_bn_relu(v, w, b, g, be):
        y = jnp.dot(v.astype(matmul_dtype), w.astype(matmul_dtype),
                    preferred_element_type=jnp.float32) + b
        m = jnp.mean(y, axis=0, keepdims=True)
        var = jnp.mean((y - m) ** 2, axis=0, keepdims=True)
        y = (y - m) * jax.lax.rsqrt(var + BN_EPS) * g + be
        return jnp.maximum(y, 0.0)

    h = lin_bn_relu(h, params["w1"], params["b1"], params["g1"], params["be1"])
    h = lin_bn_relu(h, params["w2"], params["b2"], params["g2"], params["be2"])
    return h


def init_params(key, in_channels, out_channels, max_distance):
    ks = jax.random.split(key, 6)
    lim1 = 1.0 / np.sqrt(in_channels)
    lim2 = 1.0 / np.sqrt(out_channels)
    return {
        "w1": jax.random.uniform(ks[0], (in_channels, out_channels),
                                 jnp.float32, -lim1, lim1),
        "b1": jax.random.uniform(ks[1], (1, out_channels),
                                 jnp.float32, -lim1, lim1),
        "g1": jnp.ones((1, out_channels), jnp.float32),
        "be1": jnp.zeros((1, out_channels), jnp.float32),
        "w2": jax.random.uniform(ks[2], (out_channels, out_channels),
                                 jnp.float32, -lim2, lim2),
        "b2": jax.random.uniform(ks[3], (1, out_channels),
                                 jnp.float32, -lim2, lim2),
        "g2": jnp.ones((1, out_channels), jnp.float32),
        "be2": jnp.zeros((1, out_channels), jnp.float32),
        "hop_coef": jax.random.normal(ks[4], (max_distance,), jnp.float32),
    }


if __name__ == "__main__":
    # Small deterministic graph: N=16 nodes, I=O=32 channels, K=3 hops, 64 edges.
    N, I, O, K, E = 16, 32, 32, 3, 64
    key = jax.random.PRNGKey(0)
    k_x, k_src, k_dst, k_w, k_p = jax.random.split(key, 5)

    node_embeddings = jax.random.normal(k_x, (N, I), jnp.float32)
    edge_index = jnp.stack([
        jax.random.randint(k_src, (E,), 0, N),
        jax.random.randint(k_dst, (E,), 0, N),
    ], axis=0)                                               # [2, E]
    edge_weights = jax.random.randint(k_w, (E,), 1, K + 1)   # SP lengths in [1, K]

    params = init_params(k_p, I, O, K)

    out = gin_hsp_layer(node_embeddings, edge_index, edge_weights, params,
                        max_distance=K, eps=0.0)
    out = jax.block_until_ready(out)

    ref = ref_forward(node_embeddings, edge_index, edge_weights, params,
                      max_distance=K, eps=0.0)
    np.testing.assert_allclose(np.asarray(out), np.asarray(ref),
                               rtol=1e-3, atol=1e-3)
    print("KERNEL_OK")
</pallas_src>

<mosaic_0001>
module attributes {stable_mosaic.version = 11 : i64} {
  func.func @gin_hsp_kernel(%arg0: memref<128x128xbf16, #tpu.memory_space<vmem>>, %arg1: memref<128x128xbf16, #tpu.memory_space<vmem>>, %arg2: memref<128x128xbf16, #tpu.memory_space<vmem>>, %arg3: memref<1x128xf32, #tpu.memory_space<vmem>>, %arg4: memref<1x128xf32, #tpu.memory_space<vmem>>, %arg5: memref<1x128xf32, #tpu.memory_space<vmem>>, %arg6: memref<128x128xbf16, #tpu.memory_space<vmem>>, %arg7: memref<1x128xf32, #tpu.memory_space<vmem>>, %arg8: memref<1x128xf32, #tpu.memory_space<vmem>>, %arg9: memref<1x128xf32, #tpu.memory_space<vmem>>, %arg10: memref<128x128xf32, #tpu.memory_space<vmem>>) attributes {dimension_semantics = [], scalar_prefetch = 0 : i64, scratch_operands = 0 : i64, tpu.core_type = #tpu.core_type<tc>} {
    %c0 = arith.constant 0 : index
    %c0_0 = arith.constant 0 : index
    %0 = vector.load %arg1[%c0, %c0_0] : memref<128x128xbf16, #tpu.memory_space<vmem>>, vector<128x128xbf16>
    %c0_1 = arith.constant 0 : index
    %c0_2 = arith.constant 0 : index
    %1 = vector.load %arg0[%c0_1, %c0_2] : memref<128x128xbf16, #tpu.memory_space<vmem>>, vector<128x128xbf16>
    %cst = arith.constant dense<0.000000e+00> : vector<128x128xf32>
    %2 = tpu.matmul %0, %1, %cst {dimension_numbers = #tpu.dot_dimension_numbers<[1], [0], [0], [1], [0, 0, 1, 1], [], []>} : vector<128x128xbf16>, vector<128x128xbf16>, vector<128x128xf32> -> vector<128x128xf32>
    %c0_3 = arith.constant 0 : index
    %c0_4 = arith.constant 0 : index
    %3 = vector.load %arg0[%c0_3, %c0_4] : memref<128x128xbf16, #tpu.memory_space<vmem>>, vector<128x128xbf16>
    %4 = arith.extf %3 : vector<128x128xbf16> to vector<128x128xf32>
    %cst_5 = arith.constant 1.000000e+00 : f32
    %5 = vector.broadcast %cst_5 : f32 to vector<128x128xf32>
    %6 = arith.mulf %5, %4 : vector<128x128xf32>
    %7 = arith.addf %6, %2 : vector<128x128xf32>
    %8 = tpu.iota {dimensions = array<i32: 0>} : vector<128x1xi32>
    %c16_i32 = arith.constant 16 : i32
    %9 = vector.broadcast %c16_i32 : i32 to vector<128x1xi32>
    %10 = arith.cmpi slt, %8, %9 : vector<128x1xi32>
    %11 = arith.extui %10 : vector<128x1xi1> to vector<128x1xi32>
    %12 = arith.sitofp %11 : vector<128x1xi32> to vector<128x1xf32>
    %13 = arith.truncf %7 : vector<128x128xf32> to vector<128x128xbf16>
    %c0_6 = arith.constant 0 : index
    %c0_7 = arith.constant 0 : index
    %14 = vector.load %arg2[%c0_6, %c0_7] : memref<128x128xbf16, #tpu.memory_space<vmem>>, vector<128x128xbf16>
    %cst_8 = arith.constant dense<0.000000e+00> : vector<128x128xf32>
    %15 = tpu.matmul %13, %14, %cst_8 {dimension_numbers = #tpu.dot_dimension_numbers<[1], [0], [0], [1], [0, 0, 1, 1], [], []>} : vector<128x128xbf16>, vector<128x128xbf16>, vector<128x128xf32> -> vector<128x128xf32>
    %c0_9 = arith.constant 0 : index
    %c0_10 = arith.constant 0 : index
    %16 = vector.load %arg3[%c0_9, %c0_10] : memref<1x128xf32, #tpu.memory_space<vmem>>, vector<1x128xf32>
    %17 = vector.broadcast %16 : vector<1x128xf32> to vector<128x128xf32>
    %18 = arith.addf %15, %17 : vector<128x128xf32>
    %19 = vector.broadcast %12 : vector<128x1xf32> to vector<128x128xf32>
    %20 = arith.mulf %18, %19 : vector<128x128xf32>
    %cst_11 = arith.constant dense<0.000000e+00> : vector<128xf32>
    %21 = vector.multi_reduction <add>, %20, %cst_11 [0] : vector<128x128xf32> to vector<128xf32>
    %22 = vector.shape_cast %21 : vector<128xf32> to vector<1x128xf32>
    %cst_12 = arith.constant 6.250000e-02 : f32
    %23 = vector.broadcast %cst_12 : f32 to vector<1x128xf32>
    %24 = arith.mulf %22, %23 : vector<1x128xf32>
    %25 = vector.broadcast %24 : vector<1x128xf32> to vector<128x128xf32>
    %26 = arith.subf %18, %25 : vector<128x128xf32>
    %27 = vector.broadcast %12 : vector<128x1xf32> to vector<128x128xf32>
    %28 = arith.mulf %26, %27 : vector<128x128xf32>
    %29 = arith.mulf %28, %28 : vector<128x128xf32>
    %cst_13 = arith.constant dense<0.000000e+00> : vector<128xf32>
    %30 = vector.multi_reduction <add>, %29, %cst_13 [0] : vector<128x128xf32> to vector<128xf32>
    %31 = vector.shape_cast %30 : vector<128xf32> to vector<1x128xf32>
    %cst_14 = arith.constant 6.250000e-02 : f32
    %32 = vector.broadcast %cst_14 : f32 to vector<1x128xf32>
    %33 = arith.mulf %31, %32 : vector<1x128xf32>
    %34 = vector.broadcast %24 : vector<1x128xf32> to vector<128x128xf32>
    %35 = arith.subf %18, %34 : vector<128x128xf32>
    %cst_15 = arith.constant 9.99999974E-6 : f32
    %36 = vector.broadcast %cst_15 : f32 to vector<1x128xf32>
    %37 = arith.addf %33, %36 : vector<1x128xf32>
    %38 = math.rsqrt %37 : vector<1x128xf32>
    %39 = vector.broadcast %38 : vector<1x128xf32> to vector<128x128xf32>
    %40 = arith.mulf %35, %39 : vector<128x128xf32>
    %c0_16 = arith.constant 0 : index
    %c0_17 = arith.constant 0 : index
    %41 = vector.load %arg4[%c0_16, %c0_17] : memref<1x128xf32, #tpu.memory_space<vmem>>, vector<1x128xf32>
    %42 = vector.broadcast %41 : vector<1x128xf32> to vector<128x128xf32>
    %43 = arith.mulf %40, %42 : vector<128x128xf32>
    %c0_18 = arith.constant 0 : index
    %c0_19 = arith.constant 0 : index
    %44 = vector.load %arg5[%c0_18, %c0_19] : memref<1x128xf32, #tpu.memory_space<vmem>>, vector<1x128xf32>
    %45 = vector.broadcast %44 : vector<1x128xf32> to vector<128x128xf32>
    %46 = arith.addf %43, %45 : vector<128x128xf32>
    %cst_20 = arith.constant 0.000000e+00 : f32
    %47 = vector.broadcast %cst_20 : f32 to vector<128x128xf32>
    %48 = arith.maximumf %46, %47 : vector<128x128xf32>
    %49 = arith.truncf %48 : vector<128x128xf32> to vector<128x128xbf16>
    %c0_21 = arith.constant 0 : index
    %c0_22 = arith.constant 0 : index
    %50 = vector.load %arg6[%c0_21, %c0_22] : memref<128x128xbf16, #tpu.memory_space<vmem>>, vector<128x128xbf16>
    %cst_23 = arith.constant dense<0.000000e+00> : vector<128x128xf32>
    %51 = tpu.matmul %49, %50, %cst_23 {dimension_numbers = #tpu.dot_dimension_numbers<[1], [0], [0], [1], [0, 0, 1, 1], [], []>} : vector<128x128xbf16>, vector<128x128xbf16>, vector<128x128xf32> -> vector<128x128xf32>
    %c0_24 = arith.constant 0 : index
    %c0_25 = arith.constant 0 : index
    %52 = vector.load %arg7[%c0_24, %c0_25] : memref<1x128xf32, #tpu.memory_space<vmem>>, vector<1x128xf32>
    %53 = vector.broadcast %52 : vector<1x128xf32> to vector<128x128xf32>
    %54 = arith.addf %51, %53 : vector<128x128xf32>
    %55 = vector.broadcast %12 : vector<128x1xf32> to vector<128x128xf32>
    %56 = arith.mulf %54, %55 : vector<128x128xf32>
    %cst_26 = arith.constant dense<0.000000e+00> : vector<128xf32>
    %57 = vector.multi_reduction <add>, %56, %cst_26 [0] : vector<128x128xf32> to vector<128xf32>
    %58 = vector.shape_cast %57 : vector<128xf32> to vector<1x128xf32>
    %cst_27 = arith.constant 6.250000e-02 : f32
    %59 = vector.broadcast %cst_27 : f32 to vector<1x128xf32>
    %60 = arith.mulf %58, %59 : vector<1x128xf32>
    %61 = vector.broadcast %60 : vector<1x128xf32> to vector<128x128xf32>
    %62 = arith.subf %54, %61 : vector<128x128xf32>
    %63 = vector.broadcast %12 : vector<128x1xf32> to vector<128x128xf32>
    %64 = arith.mulf %62, %63 : vector<128x128xf32>
    %65 = arith.mulf %64, %64 : vector<128x128xf32>
    %cst_28 = arith.constant dense<0.000000e+00> : vector<128xf32>
    %66 = vector.multi_reduction <add>, %65, %cst_28 [0] : vector<128x128xf32> to vector<128xf32>
    %67 = vector.shape_cast %66 : vector<128xf32> to vector<1x128xf32>
    %cst_29 = arith.constant 6.250000e-02 : f32
    %68 = vector.broadcast %cst_29 : f32 to vector<1x128xf32>
    %69 = arith.mulf %67, %68 : vector<1x128xf32>
    %70 = vector.broadcast %60 : vector<1x128xf32> to vector<128x128xf32>
    %71 = arith.subf %54, %70 : vector<128x128xf32>
    %cst_30 = arith.constant 9.99999974E-6 : f32
    %72 = vector.broadcast %cst_30 : f32 to vector<1x128xf32>
    %73 = arith.addf %69, %72 : vector<1x128xf32>
    %74 = math.rsqrt %73 : vector<1x128xf32>
    %75 = vector.broadcast %74 : vector<1x128xf32> to vector<128x128xf32>
    %76 = arith.mulf %71, %75 : vector<128x128xf32>
    %c0_31 = arith.constant 0 : index
    %c0_32 = arith.constant 0 : index
    %77 = vector.load %arg8[%c0_31, %c0_32] : memref<1x128xf32, #tpu.memory_space<vmem>>, vector<1x128xf32>
    %78 = vector.broadcast %77 : vector<1x128xf32> to vector<128x128xf32>
    %79 = arith.mulf %76, %78 : vector<128x128xf32>
    %c0_33 = arith.constant 0 : index
    %c0_34 = arith.constant 0 : index
    %80 = vector.load %arg9[%c0_33, %c0_34] : memref<1x128xf32, #tpu.memory_space<vmem>>, vector<1x128xf32>
    %81 = vector.broadcast %80 : vector<1x128xf32> to vector<128x128xf32>
    %82 = arith.addf %79, %81 : vector<128x128xf32>
    %cst_35 = arith.constant 0.000000e+00 : f32
    %83 = vector.broadcast %cst_35 : f32 to vector<128x128xf32>
    %84 = arith.maximumf %82, %83 : vector<128x128xf32>
    %c0_36 = arith.constant 0 : index
    %c0_37 = arith.constant 0 : index
    %85 = vector.load %arg10[%c0_36, %c0_37] : memref<128x128xf32, #tpu.memory_space<vmem>>, vector<128x128xf32>
    tpu.vector_store %arg10[%c0_36, %c0_37], %84 {strides = array<i32>} : memref<128x128xf32, #tpu.memory_space<vmem>>, vector<128x128xf32>,
    return
  }
}

</mosaic_0001>

<bundles_post_ra>
// kernel: tpu_custom_call.1
= control target key start
LH: loop header
LB: loop body
LE: loop exit
PB: predicated region body
PF: predicated region fallthrough
CT: control target
= control target key end

     0   :  { %15 = vsyncpa [#allocation3], 0  ;;  %s1945_s0 = inlined_call_operand.hbm [shape: bf16[128,128], index: 0, kind: input, shape index: {}]   ;;  %s1946_s1 = inlined_call_operand.hbm [shape: bf16[128,128], index: 1, kind: input, shape index: {}]   ;;  %s1947_s2 = inlined_call_operand.hbm [shape: bf16[128,128], index: 2, kind: input, shape index: {}]   ;;  %s1948_s3 = inlined_call_operand.vmem [shape: f32[1,128], index: 3, kind: input, shape index: {}]   ;;  %s1949_s4 = inlined_call_operand.vmem [shape: f32[1,128], index: 4, kind: input, shape index: {}]   ;;  %s1950_s5 = inlined_call_operand.vmem [shape: f32[1,128], index: 5, kind: input, shape index: {}]   ;;  %s1951_s6 = inlined_call_operand.hbm [shape: bf16[128,128], index: 6, kind: input, shape index: {}]   ;;  %s1952_s7 = inlined_call_operand.vmem [shape: f32[1,128], index: 7, kind: input, shape index: {}]   ;;  %s1953_s8 = inlined_call_operand.vmem [shape: f32[1,128], index: 8, kind: input, shape index: {}]   ;;  %s1954_s9 = inlined_call_operand.vmem [shape: f32[1,128], index: 9, kind: input, shape index: {}]   ;;  %s1955_s10 = inlined_call_operand.hbm [shape: f32[128,128], index: 10, kind: output, shape index: {}]  }
   0x1   :  { %16 = vsyncpa [#allocation6], 0 }
   0x2   :  { %17 = vsyncpa [#allocation9], 0 }
   0x3   :  { %18 = vsyncpa [#allocation4], 0  ;;  %s1546_s13 = smov [#allocation5]   ;;  %s1547_s15 = smov [#allocation2]  }
   0x4   :  { %s36_s14 = sshll.u32 %s1546_s13, 4  ;;  %s24_s16 = sshll.u32 %s1547_s15, 4  ;;  %s37_s14 = int_to_ptr.vmem [resolvable:$true] %s36_s14  ;;  %s1610_s16 = int_to_ptr.vmem [resolvable:$true] %s24_s16 }
   0x5   :  { %s1428_s19 = scalar_lea.hbm %s1946_s1, 1024 }
   0x6   :  { %p1429_p0 = scmp.ne.s32.totalorder %s1946_s1, %s1428_s19  ;;  %p1432_p1 = scmp.lt.u32.totalorder %s1428_s19, %s1946_s1 }
   0x8   :  { %p1434_p2 = pnand %p1432_p1, %p1429_p0 }
   0xa   :  { %1437 = shalt.err (!%p1434_p2)
}
   0xb   :  { %s1438_s24 = scalar_lea.vmem %s37_s14, 1024  ;;  %p1443_p4 = scmp.lt.s32.totalorder %s37_s14, %s37_s14 }
   0xc   :  { %p1439_p3 = scmp.ne.s32.totalorder %s37_s14, %s1438_s24  ;;  %p1444_p5 = scmp.lt.s32.totalorder %s1438_s24, %s1438_s24 }
   0xe   :  { %p1445_p6 = por %p1444_p5, %p1443_p4 }
  0x10   :  { %p1446_p7 = pnand %p1445_p6, %p1439_p3 }
  0x12   :  { %1449 = shalt.err (!%p1446_p7)
}
  0x13   :  { %s1548_s25 = smov 64   ;;  %s1549_s26 = smov 4  }
  0x14   :  { %42 = dma.hbm_to_vmem [thread:$0]  %s1946_s1, 1024, %s37_s14, [#allocation6], %s1548_s25, %s1548_s25, %s1549_s26  }
  0x15   :  { %s1450_s11 = scalar_lea.hbm %s1945_s0, 1024 }
  0x16   :  { %p1451_p8 = scmp.ne.s32.totalorder %s1945_s0, %s1450_s11  ;;  %p1454_p9 = scmp.lt.u32.totalorder %s1450_s11, %s1945_s0 }
  0x18   :  { %p1456_p10 = pnand %p1454_p9, %p1451_p8 }
  0x1a   :  { %1459 = shalt.err (!%p1456_p10)
}
  0x1b   :  { %s1460_s18 = scalar_lea.vmem %s1610_s16, 1024  ;;  %p1465_p12 = scmp.lt.s32.totalorder %s1610_s16, %s1610_s16 }
  0x1c   :  { %p1461_p11 = scmp.ne.s32.totalorder %s1610_s16, %s1460_s18  ;;  %p1466_p13 = scmp.lt.s32.totalorder %s1460_s18, %s1460_s18 }
  0x1e   :  { %p1467_p0 = por %p1466_p13, %p1465_p12 }
  0x20   :  { %p1468_p1 = pnand %p1467_p0, %p1461_p11 }
  0x22   :  { %1471 = shalt.err (!%p1468_p1)
}
  0x23   :  { %30 = dma.hbm_to_vmem [thread:$0]  %s1945_s0, 1024, %s1610_s16, [#allocation3], %s1548_s25, %s1548_s25, %s1549_s26  }
  0x24   :  { %s1550_s19 = smov [#allocation7]   ;;  %s1551_s21 = smov [#allocation8]  }
  0x25   :  { %s48_s20 = sshll.u32 %s1550_s19, 4  ;;  %s66_s22 = sshll.u32 %s1551_s21, 4  ;;  %s49_s20 = int_to_ptr.vmem [resolvable:$true] %s48_s20  ;;  %s1647_s22 = int_to_ptr.vmem [resolvable:$true] %s66_s22 }
  0x26   :  { %s1472_s27 = scalar_lea.hbm %s1947_s2, 1024 }
  0x27   :  { %p1473_p2 = scmp.ne.s32.totalorder %s1947_s2, %s1472_s27  ;;  %p1476_p3 = scmp.lt.u32.totalorder %s1472_s27, %s1947_s2 }
  0x29   :  { %p1478_p4 = pnand %p1476_p3, %p1473_p2 }
  0x2b   :  { %1481 = shalt.err (!%p1478_p4)
}
  0x2c   :  { %s1482_s0 = scalar_lea.vmem %s49_s20, 1024  ;;  %p1487_p6 = scmp.lt.s32.totalorder %s49_s20, %s49_s20 }
  0x2d   :  { %p1483_p5 = scmp.ne.s32.totalorder %s49_s20, %s1482_s0  ;;  %p1488_p7 = scmp.lt.s32.totalorder %s1482_s0, %s1482_s0 }
  0x2f   :  { %p1489_p8 = por %p1488_p7, %p1487_p6 }
  0x31   :  { %p1490_p9 = pnand %p1489_p8, %p1483_p5 }
  0x33   :  { %1493 = shalt.err (!%p1490_p9)
}
  0x34   :  { %54 = dma.hbm_to_vmem [thread:$0]  %s1947_s2, 1024, %s49_s20, [#allocation6], %s1548_s25, %s1548_s25, %s1549_s26  }
  0x35   :  { %s1494_s17 = scalar_lea.hbm %s1951_s6, 1024 }
  0x36   :  { %p1495_p10 = scmp.ne.s32.totalorder %s1951_s6, %s1494_s17  ;;  %p1498_p11 = scmp.lt.u32.totalorder %s1494_s17, %s1951_s6 }
  0x38   :  { %p1500_p12 = pnand %p1498_p11, %p1495_p10 }
  0x3a   :  { %1503 = shalt.err (!%p1500_p12)
}
  0x3b   :  { %s1504_s21 = scalar_lea.vmem %s1647_s22, 1024  ;;  %p1509_p0 = scmp.lt.s32.totalorder %s1647_s22, %s1647_s22 }
  0x3c   :  { %p1505_p13 = scmp.ne.s32.totalorder %s1647_s22, %s1504_s21  ;;  %p1510_p1 = scmp.lt.s32.totalorder %s1504_s21, %s1504_s21 }
  0x3e   :  { %p1511_p2 = por %p1510_p1, %p1509_p0 }
  0x40   :  { %p1512_p3 = pnand %p1511_p2, %p1505_p13 }
  0x42   :  { %1515 = shalt.err (!%p1512_p3)
}
  0x43   :  { %72 = dma.hbm_to_vmem [thread:$0]  %s1951_s6, 1024, %s1647_s22, [#allocation9], %s1548_s25, %s1548_s25, %s1549_s26  }
  0x44   :  { %1538 = dma.done.wait [#allocation3], 1024  }
  0x45   :  { %1539 = vsyncadd [#allocation3], 4294966272 }
  0x46   :  { %1540 = dma.done.wait [#allocation6], 2048  }
  0x47   :  { %1541 = vsyncadd [#allocation6], 4294965248 }
  0x48   :  { %1542 = dma.done.wait [#allocation9], 1024  }
  0x49   :  { %1543 = vsyncadd [#allocation9], 4294966272  ;;  %v1684_v0 = vld [vmem:[#allocation2] sm:$0xff]   ;;  %v1686_v1 = vld [vmem:[#allocation2 + $0x8] sm:$0xff]  }
  0x4a   :  { %v1688_v2 = vld [vmem:[#allocation2 + $0x10] sm:$0xff]   ;;  %1263 = vmatprep.subr.bf16.mxu0 %v1684_v0  ;;  %v1392_v3 = vld [vmem:[#allocation5] sm:$0xff]   ;;  %v1693_v4 = vld [vmem:[#allocation2 + $0x18] sm:$0xff]   ;;  %v319_v24 = vunpack.c.l.bf16 %v1686_v1  ;;  %v320_v25 = vunpack.c.h.bf16 %v1686_v1  ;;  %v317_v27 = vunpack.c.l.bf16 %v1684_v0  ;;  %v318_v28 = vunpack.c.h.bf16 %v1684_v0 }
  0x4b   :  { %1264 = vmatpush3.bf16.msra.mxu0 %v1684_v0  ;;  %1279 = vmatprep.mubr.bf16.mxu0 %v1392_v3  ;;  %v1697_v5 = vld [vmem:[#allocation2 + $0x20] sm:$0xff]   ;;  %v1401_v7 = vld [vmem:[#allocation7 + $0x8] sm:$0xff]   ;;  %v1402_v9 = vld [vmem:[#allocation7 + $0x10] sm:$0xff]   ;;  %v323_v38 = vunpack.c.l.bf16 %v1693_v4  ;;  %v324_v39 = vunpack.c.h.bf16 %v1693_v4  ;;  %v321_v41 = vunpack.c.l.bf16 %v1688_v2  ;;  %v322_v42 = vunpack.c.h.bf16 %v1688_v2 }
  0x4c   :  { %1265 = vmatprep.subr.bf16.mxu0 %v1686_v1  ;;  %v1400_v6 = vld [vmem:[#allocation7] sm:$0xff]   ;;  %v1701_v8 = vld [vmem:[#allocation2 + $0x28] sm:$0xff]   ;;  %v1704_v10 = vld [vmem:[#allocation2 + $0x30] sm:$0xff]   ;;  %v325_v55 = vunpack.c.l.bf16 %v1697_v5  ;;  %v326_v56 = vunpack.c.h.bf16 %v1697_v5 }
  0x4d   :  { %1295 = vmatprep.subr.bf16.mxu1 %v1400_v6  ;;  %v1403_v11 = vld [vmem:[#allocation7 + $0x18] sm:$0xff]   ;;  %v1404_v13 = vld [vmem:[#allocation7 + $0x20] sm:$0xff]   ;;  %v1405_v14 = vld [vmem:[#allocation7 + $0x28] sm:$0xff]   ;;  %v327_v52 = vunpack.c.l.bf16 %v1701_v8  ;;  %v328_v53 = vunpack.c.h.bf16 %v1701_v8 }
  0x4e   :  { %1296 = vmatpush3.bf16.msra.mxu1 %v1400_v6  ;;  %v1708_v12 = vld [vmem:[#allocation2 + $0x38] sm:$0xff]   ;;  %v1393_v15 = vld [vmem:[#allocation5 + $0x8] sm:$0xff]   ;;  %v1394_v16 = vld [vmem:[#allocation5 + $0x10] sm:$0xff]   ;;  %v329_v6 = vunpack.c.l.bf16 %v1704_v10 }
  0x4f   :  { %1266 = vmatpush3.bf16.msra.mxu0 %v1686_v1  ;;  %1297 = vmatprep.subr.bf16.mxu1 %v1401_v7  ;;  %v1395_v17 = vld [vmem:[#allocation5 + $0x18] sm:$0xff]   ;;  %v1396_v18 = vld [vmem:[#allocation5 + $0x20] sm:$0xff]   ;;  %v1397_v19 = vld [vmem:[#allocation5 + $0x28] sm:$0xff]   ;;  %v332_v3 = vunpack.c.h.bf16 %v1708_v12 }
  0x50   :  { %1267 = vmatprep.subr.bf16.mxu0 %v1688_v2  ;;  %v1398_v20 = vld [vmem:[#allocation5 + $0x30] sm:$0xff]   ;;  %v1399_v21 = vld [vmem:[#allocation5 + $0x38] sm:$0xff]  }
  0x51   :  { %v1406_v22 = vld [vmem:[#allocation7 + $0x30] sm:$0xff]   ;;  %v1407_v23 = vld [vmem:[#allocation7 + $0x38] sm:$0xff]  }
  0x52   :  { %1298 = vmatpush3.bf16.msra.mxu1 %v1401_v7 }
  0x53   :  { %1268 = vmatpush3.bf16.msra.mxu0 %v1688_v2  ;;  %1299 = vmatprep.subr.bf16.mxu1 %v1402_v9  ;;  %v331_v2 = vunpack.c.l.bf16 %v1708_v12 }
  0x54   :  { %1269 = vmatprep.subr.bf16.mxu0 %v1693_v4 }
  0x56   :  { %1300 = vmatpush3.bf16.msra.mxu1 %v1402_v9 }
  0x57   :  { %1270 = vmatpush3.bf16.msra.mxu0 %v1693_v4  ;;  %1301 = vmatprep.subr.bf16.mxu1 %v1403_v11 }
  0x58   :  { %1271 = vmatprep.subr.bf16.mxu0 %v1697_v5 }
  0x5a   :  { %1302 = vmatpush3.bf16.msra.mxu1 %v1403_v11 }
  0x5b   :  { %1272 = vmatpush3.bf16.msra.mxu0 %v1697_v5  ;;  %1303 = vmatprep.subr.bf16.mxu1 %v1404_v13  ;;  %v330_v5 = vunpack.c.h.bf16 %v1704_v10 }
  0x5c   :  { %1273 = vmatprep.subr.bf16.mxu0 %v1701_v8 }
  0x5e   :  { %1304 = vmatpush3.bf16.msra.mxu1 %v1404_v13 }
  0x5f   :  { %1274 = vmatpush3.bf16.msra.mxu0 %v1701_v8  ;;  %1305 = vmatprep.subr.bf16.mxu1 %v1405_v14 }
  0x60   :  { %1275 = vmatprep.subr.bf16.mxu0 %v1704_v10 }
  0x62   :  { %1306 = vmatpush3.bf16.msra.mxu1 %v1405_v14 }
  0x63   :  { %1276 = vmatpush3.bf16.msra.mxu0 %v1704_v10  ;;  %1307 = vmatprep.subr.bf16.mxu1 %v1406_v22  ;;  %v1410_v10 = vld [vmem:[#allocation8 + $0x10] sm:$0xff]  }
  0x64   :  { %1277 = vmatprep.subr.bf16.mxu0 %v1708_v12 }
  0x66   :  { %1308 = vmatpush3.bf16.msra.mxu1 %v1406_v22  ;;  %v1414_v22 = vld [vmem:[#allocation8 + $0x30] sm:$0xff]  }
  0x67   :  { %1278 = vmatpush3.bf16.msra.mxu0 %v1708_v12  ;;  %1309 = vmatprep.subr.bf16.mxu1 %v1407_v23  ;;  %v1409_v12 = vld [vmem:[#allocation8 + $0x8] sm:$0xff]  }
  0x6a   :  { %1280 = vmatmul.mubr.bf16.vlgmr.msra.gmra.mrb[0].mxu0 %v1393_v15  ;;  %1310 = vmatpush3.bf16.msra.mxu1 %v1407_v23  ;;  %v1415_v23 = vld [vmem:[#allocation8 + $0x38] sm:$0xff]  }
  0x6b   :  { %1283 = vmatprep.mubr.bf16.mxu0 %v1394_v16 }
  0x72   :  { %1284 = vmatmul.mubr.bf16.gmra.mrb[4].mxu0 %v1395_v17 }
  0x73   :  { %1287 = vmatprep.mubr.bf16.mxu0 %v1396_v18  ;;  %v1408_v18 = vld [vmem:[#allocation8] sm:$0xff]  }
  0x74   :  { %1327 = vmatprep.subr.bf16.mxu0 %v1408_v18  ;;  %1359 = vmatprep.subr.bf16.mxu1 %v1408_v18 }
  0x75   :  { %1328 = vmatpush3.bf16.msra.mxu0 %v1408_v18 }
  0x76   :  { %1329 = vmatprep.subr.bf16.mxu0 %v1409_v12 }
  0x79   :  { %1330 = vmatpush3.bf16.msra.mxu0 %v1409_v12 }
  0x7a   :  { %1288 = vmatmul.mubr.bf16.gmra.mrb[8].mxu0 %v1397_v19  ;;  %1331 = vmatprep.subr.bf16.mxu0 %v1410_v10  ;;  %v1411_v19 = vld [vmem:[#allocation8 + $0x18] sm:$0xff]  }
  0x7b   :  { %1291 = vmatprep.mubr.bf16.mxu0 %v1398_v20  ;;  %v1412_v20 = vld [vmem:[#allocation8 + $0x20] sm:$0xff]  }
  0x7d   :  { %1332 = vmatpush3.bf16.msra.mxu0 %v1410_v10 }
  0x7e   :  { %1333 = vmatprep.subr.bf16.mxu0 %v1411_v19 }
  0x81   :  { %1334 = vmatpush3.bf16.msra.mxu0 %v1411_v19 }
  0x82   :  { %1292 = vmatmul.mubr.bf16.gmra.mrb[12].mxu0 %v1399_v21  ;;  %1335 = vmatprep.subr.bf16.mxu0 %v1412_v20  ;;  %v1413_v21 = vld [vmem:[#allocation8 + $0x28] sm:$0xff]  }
  0x85   :  { %1336 = vmatpush3.bf16.msra.mxu0 %v1412_v20 }
  0x86   :  { %1337 = vmatprep.subr.bf16.mxu0 %v1413_v21 }
  0x89   :  { %1338 = vmatpush3.bf16.msra.mxu0 %v1413_v21 }
  0x8a   :  { %1339 = vmatprep.subr.bf16.mxu0 %v1414_v22 }
  0x8d   :  { %1340 = vmatpush3.bf16.msra.mxu0 %v1414_v22 }
  0x8e   :  { %1341 = vmatprep.subr.bf16.mxu0 %v1415_v23 }
  0x91   :  { %1342 = vmatpush3.bf16.msra.mxu0 %v1415_v23 }
 0x13d   :  { %v1281_v26 = vpop.f32.mrb[0].mxu0 }
 0x13e   :  { %v254_v29 = vpop.f32.mrb[1].mxu0  ;;  %v335_v31 = vadd.f32 %v1281_v26, %v319_v24  ;;  %v1193_v24 = vld [vmem:[%s1948_s3] ss:$0 sm:$0xff] }
 0x13f   :  { %v1282_v30 = vpop.f32.mrb[2].mxu0  ;;  %v333_v34 = vadd.f32 %v317_v27, %v254_v29 }
 0x140   :  { %v336_v32 = vadd.f32 %v1282_v30, %v320_v25  ;;  %v257_v33 = vpop.f32.mrb[3].mxu0 }
 0x141   :  { %v334_v35 = vadd.f32 %v318_v28, %v257_v33 }
 0x142   :  { %v415_v36 = vpack.c.bf16 %v336_v32, %v335_v31 }
 0x143   :  { %v414_v37 = vpack.c.bf16 %v334_v35, %v333_v34 }
 0x145   :  { %v1285_v40 = vpop.f32.mrb[4].mxu0  ;;  %1311 = vmatprep.mubr.bf16.mxu1 %v414_v37 }
 0x146   :  { %v270_v43 = vpop.f32.mrb[5].mxu0  ;;  %1312 = vmatmul.mubr.bf16.vlgmr.msra.gmra.mrb[0].mxu1 %v415_v36  ;;  %v339_v45 = vadd.f32 %v1285_v40, %v323_v38 }
 0x147   :  { %v1286_v44 = vpop.f32.mrb[6].mxu0  ;;  %v337_v48 = vadd.f32 %v321_v41, %v270_v43  ;;  %1367 = vmatpush3.bf16.msra.mxu1 %v1408_v18 }
 0x148   :  { %v340_v46 = vadd.f32 %v1286_v44, %v324_v39  ;;  %v273_v47 = vpop.f32.mrb[7].mxu0  ;;  %1360 = vmatprep.subr.bf16.mxu1 %v1409_v12 }
 0x149   :  { %v338_v49 = vadd.f32 %v322_v42, %v273_v47 }
 0x14a   :  { %v417_v50 = vpack.c.bf16 %v340_v46, %v339_v45 }
 0x14b   :  { %v416_v51 = vpack.c.bf16 %v338_v49, %v337_v48  ;;  %1368 = vmatpush3.bf16.msra.mxu1 %v1409_v12 }
 0x14c   :  { %1361 = vmatprep.subr.bf16.mxu1 %v1410_v10 }
 0x14d   :  { %v1289_v54 = vpop.f32.mrb[8].mxu0  ;;  %1315 = vmatprep.mubr.bf16.mxu1 %v416_v51 }
 0x14e   :  { %v286_v57 = vpop.f32.mrb[9].mxu0  ;;  %1316 = vmatmul.mubr.bf16.gmra.mrb[4].mxu1 %v417_v50  ;;  %v343_v59 = vadd.f32 %v1289_v54, %v327_v52 }
 0x14f   :  { %v1290_v58 = vpop.f32.mrb[10].mxu0  ;;  %v341_v62 = vadd.f32 %v325_v55, %v286_v57  ;;  %1369 = vmatpush3.bf16.msra.mxu1 %v1410_v10 }
 0x150   :  { %v344_v60 = vadd.f32 %v1290_v58, %v328_v53  ;;  %v289_v61 = vpop.f32.mrb[11].mxu0  ;;  %1362 = vmatprep.subr.bf16.mxu1 %v1411_v19 }
 0x151   :  { %v342_v63 = vadd.f32 %v326_v56, %v289_v61 }
 0x152   :  { %v419_v0 = vpack.c.bf16 %v344_v60, %v343_v59 }
 0x153   :  { %v418_v1 = vpack.c.bf16 %v342_v63, %v341_v62  ;;  %1370 = vmatpush3.bf16.msra.mxu1 %v1411_v19 }
 0x154   :  { %1363 = vmatprep.subr.bf16.mxu1 %v1412_v20 }
 0x155   :  { %v1293_v4 = vpop.f32.mrb[12].mxu0  ;;  %1319 = vmatprep.mubr.bf16.mxu1 %v418_v1 }
 0x156   :  { %v302_v7 = vpop.f32.mrb[13].mxu0  ;;  %1320 = vmatmul.mubr.bf16.gmra.mrb[8].mxu1 %v419_v0  ;;  %v347_v9 = vadd.f32 %v1293_v4, %v331_v2 }
 0x157   :  { %v1294_v8 = vpop.f32.mrb[14].mxu0  ;;  %v345_v14 = vadd.f32 %v329_v6, %v302_v7  ;;  %1371 = vmatpush3.bf16.msra.mxu1 %v1412_v20 }
 0x158   :  { %v348_v11 = vadd.f32 %v1294_v8, %v332_v3  ;;  %v305_v13 = vpop.f32.mrb[15].mxu0  ;;  %1364 = vmatprep.subr.bf16.mxu1 %v1413_v21 }
 0x159   :  { %v346_v15 = vadd.f32 %v330_v5, %v305_v13 }
 0x15a   :  { %v421_v16 = vpack.c.bf16 %v348_v11, %v347_v9 }
 0x15b   :  { %v420_v17 = vpack.c.bf16 %v346_v15, %v345_v14  ;;  %1372 = vmatpush3.bf16.msra.mxu1 %v1413_v21 }
 0x15c   :  { %1365 = vmatprep.subr.bf16.mxu1 %v1414_v22 }
 0x15d   :  { %1323 = vmatprep.mubr.bf16.mxu1 %v420_v17 }
 0x15e   :  { %1324 = vmatmul.mubr.bf16.gmra.mrb[12].mxu1 %v421_v16 }
 0x15f   :  { %1373 = vmatpush3.bf16.msra.mxu1 %v1414_v22 }
 0x160   :  { %1366 = vmatprep.subr.bf16.mxu1 %v1415_v23 }
 0x163   :  { %1374 = vmatpush3.bf16.msra.mxu1 %v1415_v23 }
 0x219   :  { %v1313_v25 = vpop.f32.mrb[0].mxu1 }
 0x21a   :  { %v527_v26 = vpop.f32.mrb[1].mxu1  ;;  %v1735_v27 = vadd.f32 %v1313_v25, %v1193_v24 }
 0x21b   :  { %v1314_v28 = vpop.f32.mrb[2].mxu1  ;;  %v1737_v30 = vadd.f32 %v1193_v24, %v527_v26 }
 0x21c   :  { %v530_v29 = vpop.f32.mrb[3].mxu1  ;;  %v1739_v31 = vadd.f32 %v1314_v28, %v1193_v24  ;;  %v592_v33 = vmul.f32 0.0, %v1735_v27 }
 0x21d   :  { %v531_v32 = vadd.f32 %v1193_v24, %v530_v29 }
 0x21e   :  { %v593_v35 = vmul.f32 0.0, %v1739_v31 }
 0x21f   :  { %v606_v34 = vadd.f32 %v531_v32, %v1737_v30 }
 0x221   :  { %v607_v36 = vadd.f32 %v606_v34, %v592_v33  ;;  %v1317_v37 = vpop.f32.mrb[4].mxu1 }
 0x222   :  { %v543_v38 = vpop.f32.mrb[5].mxu1  ;;  %v552_v43 = vadd.f32 %v1317_v37, %v1193_v24 }
 0x223   :  { %v544_v39 = vadd.f32 %v1193_v24, %v543_v38  ;;  %v608_v40 = vadd.f32 %v607_v36, %v593_v35  ;;  %v1318_v41 = vpop.f32.mrb[6].mxu1 }
 0x224   :  { %v546_v42 = vpop.f32.mrb[7].mxu1  ;;  %v555_v47 = vadd.f32 %v1318_v41, %v1193_v24  ;;  %v596_v49 = vmul.f32 0.0, %v552_v43 }
 0x225   :  { %v594_v44 = vmul.f32 0.0, %v544_v39  ;;  %v547_v45 = vadd.f32 %v1193_v24, %v546_v42 }
 0x226   :  { %v597_v53 = vmul.f32 0.0, %v555_v47 }
 0x227   :  { %v609_v46 = vadd.f32 %v608_v40, %v594_v44  ;;  %v595_v48 = vmul.f32 0.0, %v547_v45 }
 0x229   :  { %v610_v50 = vadd.f32 %v609_v46, %v595_v48  ;;  %v1321_v51 = vpop.f32.mrb[8].mxu1 }
 0x22a   :  { %v559_v52 = vpop.f32.mrb[9].mxu1  ;;  %v568_v58 = vadd.f32 %v1321_v51, %v1193_v24 }
 0x22b   :  { %v611_v54 = vadd.f32 %v610_v50, %v596_v49  ;;  %v560_v55 = vadd.f32 %v1193_v24, %v559_v52  ;;  %v1322_v56 = vpop.f32.mrb[10].mxu1 }
 0x22c   :  { %v562_v57 = vpop.f32.mrb[11].mxu1  ;;  %v571_v63 = vadd.f32 %v1322_v56, %v1193_v24  ;;  %v600_v1 = vmul.f32 0.0, %v568_v58 }
 0x22d   :  { %v598_v59 = vmul.f32 0.0, %v560_v55  ;;  %v612_v60 = vadd.f32 %v611_v54, %v597_v53  ;;  %v563_v61 = vadd.f32 %v1193_v24, %v562_v57 }
 0x22e   :  { %v601_v6 = vmul.f32 0.0, %v571_v63 }
 0x22f   :  { %v613_v62 = vadd.f32 %v612_v60, %v598_v59  ;;  %v599_v0 = vmul.f32 0.0, %v563_v61 }
 0x231   :  { %v614_v2 = vadd.f32 %v613_v62, %v599_v0  ;;  %v1325_v3 = vpop.f32.mrb[12].mxu1 }
 0x232   :  { %v575_v4 = vpop.f32.mrb[13].mxu1  ;;  %v584_v11 = vadd.f32 %v1325_v3, %v1193_v24 }
 0x233   :  { %v615_v5 = vadd.f32 %v614_v2, %v600_v1  ;;  %v576_v7 = vadd.f32 %v1193_v24, %v575_v4  ;;  %v1326_v8 = vpop.f32.mrb[14].mxu1 }
 0x234   :  { %v578_v9 = vpop.f32.mrb[15].mxu1  ;;  %v587_v17 = vadd.f32 %v1326_v8, %v1193_v24  ;;  %v604_v12 = vmul.f32 0.0, %v584_v11 }
 0x235   :  { %v602_v13 = vmul.f32 0.0, %v576_v7  ;;  %v616_v14 = vadd.f32 %v615_v5, %v601_v6  ;;  %v579_v15 = vadd.f32 %v1193_v24, %v578_v9 }
 0x236   :  { %v605_v19 = vmul.f32 0.0, %v587_v17 }
 0x237   :  { %v617_v16 = vadd.f32 %v616_v14, %v602_v13  ;;  %v603_v18 = vmul.f32 0.0, %v579_v15 }
 0x239   :  { %v618_v10 = vadd.f32 %v617_v16, %v603_v18 }
 0x23b   :  { %v619_v20 = vadd.f32 %v618_v10, %v604_v12 }
 0x23d   :  { %v620_v21 = vadd.f32 %v619_v20, %v605_v19 }
 0x23f   :  { %v621_v22 = vrot.slane %v620_v21, 4 }
 0x241   :  { %v622_v23 = vadd.f32 %v621_v22, %v620_v21 }
 0x243   :  { %v623_v25 = vrot.slane %v622_v23, 2 }
 0x245   :  { %v624_v26 = vadd.f32 %v623_v25, %v622_v23 }
 0x247   :  { %v625_v28 = vrot.slane %v624_v26, 1 }
 0x249   :  { %v626_v29 = vadd.f32 %v625_v28, %v624_v26 }
 0x24b   :  { %v627_v33 = vmul.f32 0.0625, %v626_v29 }
 0x24d   :  { %v1745_v34 = vsub.f32 %v1737_v30, %v627_v33  ;;  %v1747_v35 = vsub.f32 %v531_v32, %v627_v33  ;;  %v1750_v24 = vsub.f32 %v1735_v27, %v627_v33  ;;  %v1753_v36 = vsub.f32 %v1739_v31, %v627_v33 }
 0x24e   :  { %v1755_v37 = vsub.f32 %v544_v39, %v627_v33  ;;  %v1757_v38 = vsub.f32 %v547_v45, %v627_v33  ;;  %v1759_v40 = vsub.f32 %v552_v43, %v627_v33  ;;  %v1761_v41 = vsub.f32 %v555_v47, %v627_v33 }
 0x24f   :  { %v1763_v42 = vsub.f32 %v560_v55, %v627_v33  ;;  %v1765_v30 = vsub.f32 %v563_v61, %v627_v33  ;;  %v1767_v32 = vsub.f32 %v568_v58, %v627_v33  ;;  %v639_v44 = vsub.f32 %v571_v63, %v627_v33 }
 0x250   :  { %v1769_v27 = vsub.f32 %v576_v7, %v627_v33  ;;  %v641_v46 = vsub.f32 %v579_v15, %v627_v33  ;;  %v1771_v31 = vsub.f32 %v584_v11, %v627_v33  ;;  %v1773_v39 = vsub.f32 %v587_v17, %v627_v33 }
 0x251   :  { %v646_v45 = vmul.f32 0.0, %v1750_v24  ;;  %v660_v43 = vmul.f32 %v1745_v34, %v1745_v34  ;;  %v661_v47 = vmul.f32 %v1747_v35, %v1747_v35  ;;  %v647_v48 = vmul.f32 0.0, %v1753_v36 }
 0x252   :  { %v648_v50 = vmul.f32 0.0, %v1755_v37  ;;  %v649_v52 = vmul.f32 0.0, %v1757_v38  ;;  %v650_v55 = vmul.f32 0.0, %v1759_v40  ;;  %v651_v58 = vmul.f32 0.0, %v1761_v41 }
 0x253   :  { %v662_v49 = vmul.f32 %v646_v45, %v646_v45  ;;  %v676_v51 = vadd.f32 %v661_v47, %v660_v43  ;;  %v663_v53 = vmul.f32 %v647_v48, %v647_v48  ;;  %v652_v61 = vmul.f32 0.0, %v1763_v42 }
 0x254   :  { %v664_v56 = vmul.f32 %v648_v50, %v648_v50  ;;  %v665_v59 = vmul.f32 %v649_v52, %v649_v52  ;;  %v666_v62 = vmul.f32 %v650_v55, %v650_v55  ;;  %v653_v0 = vmul.f32 0.0, %v1765_v30 }
 0x255   :  { %v677_v54 = vadd.f32 %v676_v51, %v662_v49  ;;  %v667_v1 = vmul.f32 %v651_v58, %v651_v58  ;;  %v654_v3 = vmul.f32 0.0, %v1767_v32  ;;  %v668_v4 = vmul.f32 %v652_v61, %v652_v61  ;;  %v1794_v51 = vld [vmem:[%s1949_s4] ss:$0 sm:$0xff] }
 0x256   :  { %v655_v5 = vmul.f32 0.0, %v639_v44  ;;  %v669_v7 = vmul.f32 %v653_v0, %v653_v0  ;;  %v656_v9 = vmul.f32 0.0, %v1769_v27  ;;  %v657_v14 = vmul.f32 0.0, %v641_v46 }
 0x257   :  { %v678_v57 = vadd.f32 %v677_v54, %v663_v53  ;;  %v670_v11 = vmul.f32 %v654_v3, %v654_v3  ;;  %v658_v17 = vmul.f32 0.0, %v1771_v31  ;;  %v659_v10 = vmul.f32 0.0, %v1773_v39 }
 0x258   :  { %v671_v15 = vmul.f32 %v655_v5, %v655_v5  ;;  %v672_v18 = vmul.f32 %v656_v9, %v656_v9  ;;  %v673_v19 = vmul.f32 %v657_v14, %v657_v14 }
 0x259   :  { %v679_v60 = vadd.f32 %v678_v57, %v664_v56  ;;  %v674_v21 = vmul.f32 %v658_v17, %v658_v17  ;;  %v675_v23 = vmul.f32 %v659_v10, %v659_v10  ;;  %v1801_v56 = vld [vmem:[%s1950_s5] ss:$0 sm:$0xff] }
 0x25b   :  { %v680_v63 = vadd.f32 %v679_v60, %v665_v59 }
 0x25d   :  { %v681_v2 = vadd.f32 %v680_v63, %v666_v62 }
 0x25f   :  { %v682_v6 = vadd.f32 %v681_v2, %v667_v1 }
 0x261   :  { %v683_v8 = vadd.f32 %v682_v6, %v668_v4 }
 0x263   :  { %v684_v13 = vadd.f32 %v683_v8, %v669_v7 }
 0x265   :  { %v685_v16 = vadd.f32 %v684_v13, %v670_v11 }
 0x267   :  { %v686_v12 = vadd.f32 %v685_v16, %v671_v15 }
 0x269   :  { %v687_v20 = vadd.f32 %v686_v12, %v672_v18 }
 0x26b   :  { %v688_v22 = vadd.f32 %v687_v20, %v673_v19 }
 0x26d   :  { %v689_v25 = vadd.f32 %v688_v22, %v674_v21 }
 0x26f   :  { %v690_v26 = vadd.f32 %v689_v25, %v675_v23 }
 0x271   :  { %v691_v28 = vrot.slane %v690_v26, 4 }
 0x273   :  { %v692_v29 = vadd.f32 %v691_v28, %v690_v26 }
 0x275   :  { %v693_v33 = vrot.slane %v692_v29, 2 }
 0x277   :  { %v694_v45 = vadd.f32 %v693_v33, %v692_v29 }
 0x279   :  { %v695_v43 = vrot.slane %v694_v45, 1 }
 0x27b   :  { %v696_v47 = vadd.f32 %v695_v43, %v694_v45 }
 0x27d   :  { %v697_v48 = vmul.f32 0.0625, %v696_v47 }
 0x27f   :  { %v698_v49 = vadd.f32 1e-05, %v697_v48 }
 0x281   :  { %1424 = vrsqrt.f32 %v698_v49 }
 0x28b   :  { %v1425_v50 = vpop.eup %1424 }
 0x28c   :  { %v711_v52 = vmul.f32 %v1425_v50, %v639_v44  ;;  %v713_v53 = vmul.f32 %v1425_v50, %v641_v46  ;;  %v700_v54 = vmul.f32 %v1425_v50, %v1745_v34  ;;  %v701_v55 = vmul.f32 %v1425_v50, %v1747_v35 }
 0x28d   :  { %v708_v57 = vmul.f32 %v1425_v50, %v1763_v42  ;;  %v709_v58 = vmul.f32 %v1425_v50, %v1765_v30  ;;  %v702_v59 = vmul.f32 %v1425_v50, %v1750_v24  ;;  %v703_v60 = vmul.f32 %v1425_v50, %v1753_v36 }
 0x28e   :  { %v736_v44 = vmul.f32 %v1794_v51, %v713_v53  ;;  %v723_v46 = vmul.f32 %v1794_v51, %v700_v54  ;;  %v724_v34 = vmul.f32 %v1794_v51, %v701_v55  ;;  %v710_v35 = vmul.f32 %v1425_v50, %v1767_v32 }
 0x28f   :  { %v731_v61 = vmul.f32 %v1794_v51, %v708_v57  ;;  %v732_v62 = vmul.f32 %v1794_v51, %v709_v58  ;;  %v725_v42 = vmul.f32 %v1794_v51, %v702_v59  ;;  %v726_v30 = vmul.f32 %v1794_v51, %v703_v60 }
 0x290   :  { %v746_v24 = vadd.f32 %v1801_v56, %v723_v46  ;;  %v747_v36 = vadd.f32 %v1801_v56, %v724_v34  ;;  %v733_v63 = vmul.f32 %v1794_v51, %v710_v35  ;;  %v734_v0 = vmul.f32 %v1794_v51, %v711_v52 }
 0x291   :  { %v754_v1 = vadd.f32 %v1801_v56, %v731_v61  ;;  %v755_v32 = vadd.f32 %v1801_v56, %v732_v62  ;;  %v748_v2 = vadd.f32 %v1801_v56, %v725_v42  ;;  %v749_v3 = vadd.f32 %v1801_v56, %v726_v30 }
 0x292   :  { %v762_v4 = vmax.f32 %v746_v24, 0.0  ;;  %v763_v6 = vmax.f32 %v747_v36, 0.0  ;;  %v756_v5 = vadd.f32 %v1801_v56, %v733_v63  ;;  %v757_v7 = vadd.f32 %v1801_v56, %v734_v0 }
 0x293   :  { %v770_v8 = vmax.f32 %v754_v1, 0.0  ;;  %v771_v9 = vmax.f32 %v755_v32, 0.0  ;;  %v764_v11 = vmax.f32 %v748_v2, 0.0  ;;  %v765_v13 = vmax.f32 %v749_v3, 0.0 }
 0x294   :  { %v778_v14 = vpack.c.bf16 %v763_v6, %v762_v4  ;;  %v772_v15 = vmax.f32 %v756_v5, 0.0  ;;  %v773_v16 = vmax.f32 %v757_v7, 0.0  ;;  %v704_v17 = vmul.f32 %v1425_v50, %v1755_v37 }
 0x295   :  { %v782_v18 = vpack.c.bf16 %v771_v9, %v770_v8  ;;  %v779_v12 = vpack.c.bf16 %v765_v13, %v764_v11  ;;  %v705_v10 = vmul.f32 %v1425_v50, %v1757_v38  ;;  %v712_v19 = vmul.f32 %v1425_v50, %v1769_v27 }
 0x296   :  { %1343 = vmatprep.mubr.bf16.mxu0 %v778_v14  ;;  %v783_v20 = vpack.c.bf16 %v773_v16, %v772_v15  ;;  %v727_v21 = vmul.f32 %v1794_v51, %v704_v17  ;;  %v759_v22 = vadd.f32 %v1801_v56, %v736_v44  ;;  %v706_v23 = vmul.f32 %v1425_v50, %v1759_v40 }
 0x297   :  { %1351 = vmatprep.mubr.bf16.mxu1 %v782_v18  ;;  %1344 = vmatmul.mubr.bf16.vlgmr.msra.gmra.mrb[16].mxu0 %v779_v12  ;;  %v728_v25 = vmul.f32 %v1794_v51, %v705_v10  ;;  %v735_v37 = vmul.f32 %v1794_v51, %v712_v19  ;;  %v707_v26 = vmul.f32 %v1425_v50, %v1761_v41 }
 0x298   :  { %1352 = vmatmul.mubr.bf16.vlgmr.msra.gmra.mrb[16].mxu1 %v783_v20  ;;  %v750_v38 = vadd.f32 %v1801_v56, %v727_v21  ;;  %v775_v27 = vmax.f32 %v759_v22, 0.0  ;;  %v729_v28 = vmul.f32 %v1794_v51, %v706_v23  ;;  %v714_v29 = vmul.f32 %v1425_v50, %v1771_v31 }
 0x299   :  { %v751_v33 = vadd.f32 %v1801_v56, %v728_v25  ;;  %v758_v40 = vadd.f32 %v1801_v56, %v735_v37  ;;  %v730_v45 = vmul.f32 %v1794_v51, %v707_v26  ;;  %v715_v43 = vmul.f32 %v1425_v50, %v1773_v39 }
 0x29a   :  { %v766_v47 = vmax.f32 %v750_v38, 0.0  ;;  %v752_v48 = vadd.f32 %v1801_v56, %v729_v28  ;;  %v737_v41 = vmul.f32 %v1794_v51, %v714_v29 }
 0x29b   :  { %v767_v49 = vmax.f32 %v751_v33, 0.0  ;;  %v774_v52 = vmax.f32 %v758_v40, 0.0  ;;  %v753_v53 = vadd.f32 %v1801_v56, %v730_v45  ;;  %v738_v54 = vmul.f32 %v1794_v51, %v715_v43  ;;  %v1204_v51 = vld [vmem:[%s1952_s7] ss:$0 sm:$0xff] }
 0x29c   :  { %v768_v31 = vmax.f32 %v752_v48, 0.0  ;;  %v760_v55 = vadd.f32 %v1801_v56, %v737_v41 }
 0x29d   :  { %v780_v57 = vpack.c.bf16 %v767_v49, %v766_v47  ;;  %v784_v58 = vpack.c.bf16 %v775_v27, %v774_v52  ;;  %v769_v59 = vmax.f32 %v753_v53, 0.0  ;;  %v761_v60 = vadd.f32 %v1801_v56, %v738_v54 }
 0x29e   :  { %v776_v39 = vmax.f32 %v760_v55, 0.0 }
 0x29f   :  { %1347 = vmatprep.mubr.bf16.mxu0 %v780_v57  ;;  %1355 = vmatprep.mubr.bf16.mxu1 %v784_v58  ;;  %v781_v50 = vpack.c.bf16 %v769_v59, %v768_v31  ;;  %v777_v44 = vmax.f32 %v761_v60, 0.0 }
 0x2a1   :  { %1348 = vmatmul.mubr.bf16.gmra.mrb[20].mxu0 %v781_v50  ;;  %v785_v46 = vpack.c.bf16 %v777_v44, %v776_v39 }
 0x2a3   :  { %1356 = vmatmul.mubr.bf16.gmra.mrb[20].mxu1 %v785_v46 }
 0x36a   :  { %v1345_v34 = vpop.f32.mrb[16].mxu0 }
 0x36b   :  { %v1353_v35 = vpop.f32.mrb[16].mxu1  ;;  %v891_v61 = vpop.f32.mrb[17].mxu0  ;;  %v1850_v62 = vadd.f32 %v1345_v34, %v1204_v51 }
 0x36c   :  { %v923_v42 = vpop.f32.mrb[17].mxu1  ;;  %v1346_v30 = vpop.f32.mrb[18].mxu0  ;;  %v892_v36 = vadd.f32 %v1204_v51, %v891_v61  ;;  %v932_v38 = vadd.f32 %v1353_v35, %v1204_v51 }
 0x36d   :  { %v1354_v56 = vpop.f32.mrb[18].mxu1  ;;  %v894_v24 = vpop.f32.mrb[19].mxu0  ;;  %v903_v63 = vadd.f32 %v1346_v30, %v1204_v51  ;;  %v956_v32 = vmul.f32 0.0, %v1850_v62  ;;  %v924_v21 = vadd.f32 %v1204_v51, %v923_v42 }
 0x36e   :  { %v895_v0 = vadd.f32 %v1204_v51, %v894_v24  ;;  %v926_v1 = vpop.f32.mrb[19].mxu1  ;;  %v935_v29 = vadd.f32 %v1354_v56, %v1204_v51  ;;  %v964_v45 = vmul.f32 0.0, %v932_v38 }
 0x36f   :  { %v957_v3 = vmul.f32 0.0, %v903_v63  ;;  %v927_v25 = vadd.f32 %v1204_v51, %v926_v1  ;;  %v962_v27 = vmul.f32 0.0, %v924_v21 }
 0x370   :  { %v970_v2 = vadd.f32 %v895_v0, %v892_v36  ;;  %v965_v48 = vmul.f32 0.0, %v935_v29 }
 0x371   :  { %v963_v33 = vmul.f32 0.0, %v927_v25 }
 0x372   :  { %v971_v4 = vadd.f32 %v970_v2, %v956_v32 }
 0x374   :  { %v1349_v6 = vpop.f32.mrb[20].mxu0  ;;  %v972_v5 = vadd.f32 %v971_v4, %v957_v3 }
 0x375   :  { %v907_v7 = vpop.f32.mrb[21].mxu0  ;;  %v916_v15 = vadd.f32 %v1349_v6, %v1204_v51 }
 0x376   :  { %v1357_v8 = vpop.f32.mrb[20].mxu1  ;;  %v908_v9 = vadd.f32 %v1204_v51, %v907_v7  ;;  %v1350_v11 = vpop.f32.mrb[22].mxu0 }
 0x377   :  { %v939_v13 = vpop.f32.mrb[21].mxu1  ;;  %v910_v14 = vpop.f32.mrb[23].mxu0  ;;  %v919_v19 = vadd.f32 %v1350_v11, %v1204_v51  ;;  %v960_v22 = vmul.f32 0.0, %v916_v15  ;;  %v948_v52 = vadd.f32 %v1357_v8, %v1204_v51 }
 0x378   :  { %v958_v16 = vmul.f32 0.0, %v908_v9  ;;  %v1358_v17 = vpop.f32.mrb[22].mxu1  ;;  %v911_v18 = vadd.f32 %v1204_v51, %v910_v14  ;;  %v940_v43 = vadd.f32 %v1204_v51, %v939_v13 }
 0x379   :  { %v942_v12 = vpop.f32.mrb[23].mxu1  ;;  %v961_v37 = vmul.f32 0.0, %v919_v19  ;;  %v951_v31 = vadd.f32 %v1358_v17, %v1204_v51  ;;  %v968_v58 = vmul.f32 0.0, %v948_v52 }
 0x37a   :  { %v973_v10 = vadd.f32 %v972_v5, %v958_v16  ;;  %v959_v20 = vmul.f32 0.0, %v911_v18  ;;  %v943_v41 = vadd.f32 %v1204_v51, %v942_v12  ;;  %v966_v53 = vmul.f32 0.0, %v940_v43 }
 0x37b   :  { %v969_v60 = vmul.f32 0.0, %v951_v31 }
 0x37c   :  { %v974_v23 = vadd.f32 %v973_v10, %v959_v20  ;;  %v967_v55 = vmul.f32 0.0, %v943_v41 }
 0x37e   :  { %v975_v26 = vadd.f32 %v974_v23, %v960_v22 }
 0x380   :  { %v976_v28 = vadd.f32 %v975_v26, %v961_v37 }
 0x382   :  { %v977_v40 = vadd.f32 %v976_v28, %v962_v27 }
 0x384   :  { %v978_v47 = vadd.f32 %v977_v40, %v963_v33 }
 0x386   :  { %v979_v49 = vadd.f32 %v978_v47, %v964_v45 }
 0x388   :  { %v980_v54 = vadd.f32 %v979_v49, %v965_v48 }
 0x38a   :  { %v981_v57 = vadd.f32 %v980_v54, %v966_v53 }
 0x38c   :  { %v982_v59 = vadd.f32 %v981_v57, %v967_v55 }
 0x38e   :  { %v983_v39 = vadd.f32 %v982_v59, %v968_v58 }
 0x390   :  { %v984_v50 = vadd.f32 %v983_v39, %v969_v60 }
 0x392   :  { %v985_v44 = vrot.slane %v984_v50, 4 }
 0x394   :  { %v986_v46 = vadd.f32 %v985_v44, %v984_v50 }
 0x396   :  { %v987_v34 = vrot.slane %v986_v46, 2 }
 0x398   :  { %v988_v35 = vadd.f32 %v987_v34, %v986_v46 }
 0x39a   :  { %v989_v61 = vrot.slane %v988_v35, 1 }
 0x39c   :  { %v990_v42 = vadd.f32 %v989_v61, %v988_v35 }
 0x39e   :  { %v991_v30 = vmul.f32 0.0625, %v990_v42 }
 0x3a0   :  { %v1853_v56 = vsub.f32 %v892_v36, %v991_v30  ;;  %v1855_v24 = vsub.f32 %v895_v0, %v991_v30  ;;  %v1858_v51 = vsub.f32 %v1850_v62, %v991_v30  ;;  %v1860_v1 = vsub.f32 %v903_v63, %v991_v30 }
 0x3a1   :  { %v1862_v32 = vsub.f32 %v908_v9, %v991_v30  ;;  %v1864_v2 = vsub.f32 %v911_v18, %v991_v30  ;;  %v1866_v3 = vsub.f32 %v916_v15, %v991_v30  ;;  %v1868_v4 = vsub.f32 %v919_v19, %v991_v30 }
 0x3a2   :  { %v1870_v6 = vsub.f32 %v924_v21, %v991_v30  ;;  %v1872_v5 = vsub.f32 %v927_v25, %v991_v30  ;;  %v1874_v36 = vsub.f32 %v932_v38, %v991_v30  ;;  %v1876_v0 = vsub.f32 %v935_v29, %v991_v30 }
 0x3a3   :  { %v1878_v62 = vsub.f32 %v940_v43, %v991_v30  ;;  %v1880_v63 = vsub.f32 %v943_v41, %v991_v30  ;;  %v1882_v7 = vsub.f32 %v948_v52, %v991_v30  ;;  %v1884_v8 = vsub.f32 %v951_v31, %v991_v30 }
 0x3a4   :  { %v1010_v9 = vmul.f32 0.0, %v1858_v51  ;;  %v1024_v11 = vmul.f32 %v1853_v56, %v1853_v56  ;;  %v1025_v13 = vmul.f32 %v1855_v24, %v1855_v24  ;;  %v1011_v14 = vmul.f32 0.0, %v1860_v1 }
 0x3a5   :  { %v1012_v16 = vmul.f32 0.0, %v1862_v32  ;;  %v1013_v18 = vmul.f32 0.0, %v1864_v2  ;;  %v1014_v19 = vmul.f32 0.0, %v1866_v3  ;;  %v1015_v22 = vmul.f32 0.0, %v1868_v4 }
 0x3a6   :  { %v1026_v15 = vmul.f32 %v1010_v9, %v1010_v9  ;;  %v1040_v17 = vadd.f32 %v1025_v13, %v1024_v11  ;;  %v1027_v12 = vmul.f32 %v1011_v14, %v1011_v14  ;;  %v1016_v37 = vmul.f32 0.0, %v1870_v6 }
 0x3a7   :  { %v1028_v20 = vmul.f32 %v1012_v16, %v1012_v16  ;;  %v1029_v23 = vmul.f32 %v1013_v18, %v1013_v18  ;;  %v1030_v26 = vmul.f32 %v1014_v19, %v1014_v19  ;;  %v1017_v27 = vmul.f32 0.0, %v1872_v5 }
 0x3a8   :  { %v1041_v10 = vadd.f32 %v1040_v17, %v1026_v15  ;;  %v1031_v28 = vmul.f32 %v1015_v22, %v1015_v22  ;;  %v1018_v33 = vmul.f32 0.0, %v1874_v36  ;;  %v1032_v40 = vmul.f32 %v1016_v37, %v1016_v37 }
 0x3a9   :  { %v1019_v43 = vmul.f32 0.0, %v1876_v0  ;;  %v1033_v47 = vmul.f32 %v1017_v27, %v1017_v27  ;;  %v1020_v41 = vmul.f32 0.0, %v1878_v62  ;;  %v1021_v53 = vmul.f32 0.0, %v1880_v63 }
 0x3aa   :  { %v1042_v21 = vadd.f32 %v1041_v10, %v1027_v12  ;;  %v1034_v49 = vmul.f32 %v1018_v33, %v1018_v33  ;;  %v1022_v55 = vmul.f32 0.0, %v1882_v7  ;;  %v1023_v59 = vmul.f32 0.0, %v1884_v8 }
 0x3ab   :  { %v1035_v54 = vmul.f32 %v1019_v43, %v1019_v43  ;;  %v1036_v57 = vmul.f32 %v1020_v41, %v1020_v41  ;;  %v1037_v60 = vmul.f32 %v1021_v53, %v1021_v53 }
 0x3ac   :  { %v1043_v25 = vadd.f32 %v1042_v21, %v1028_v20  ;;  %v1038_v50 = vmul.f32 %v1022_v55, %v1022_v55  ;;  %v1039_v46 = vmul.f32 %v1023_v59, %v1023_v59 }
 0x3ae   :  { %v1044_v38 = vadd.f32 %v1043_v25, %v1029_v23  ;;  %v1213_v23 = vld [vmem:[%s1953_s8] ss:$0 sm:$0xff] }
 0x3b0   :  { %v1045_v29 = vadd.f32 %v1044_v38, %v1030_v26 }
 0x3b2   :  { %v1046_v45 = vadd.f32 %v1045_v29, %v1031_v28 }
 0x3b4   :  { %v1047_v48 = vadd.f32 %v1046_v45, %v1032_v40 }
 0x3b6   :  { %v1048_v52 = vadd.f32 %v1047_v48, %v1033_v47 }
 0x3b8   :  { %v1049_v31 = vadd.f32 %v1048_v52, %v1034_v49 }
 0x3ba   :  { %v1050_v58 = vadd.f32 %v1049_v31, %v1035_v54 }
 0x3bc   :  { %v1051_v39 = vadd.f32 %v1050_v58, %v1036_v57 }
 0x3be   :  { %v1052_v44 = vadd.f32 %v1051_v39, %v1037_v60 }
 0x3c0   :  { %v1053_v34 = vadd.f32 %v1052_v44, %v1038_v50 }
 0x3c2   :  { %v1054_v35 = vadd.f32 %v1053_v34, %v1039_v46 }
 0x3c4   :  { %v1055_v61 = vrot.slane %v1054_v35, 4 }
 0x3c6   :  { %v1056_v42 = vadd.f32 %v1055_v61, %v1054_v35 }
 0x3c8   :  { %v1057_v30 = vrot.slane %v1056_v42, 2 }
 0x3ca   :  { %v1058_v9 = vadd.f32 %v1057_v30, %v1056_v42 }
 0x3cc   :  { %v1059_v11 = vrot.slane %v1058_v9, 1 }
 0x3ce   :  { %v1060_v13 = vadd.f32 %v1059_v11, %v1058_v9 }
 0x3d0   :  { %v1061_v14 = vmul.f32 0.0625, %v1060_v13 }
 0x3d2   :  { %v1062_v15 = vadd.f32 1e-05, %v1061_v14 }
 0x3d4   :  { %1426 = vrsqrt.f32 %v1062_v15 }
 0x3de   :  { %v1427_v16 = vpop.eup %1426 }
 0x3df   :  { %v1064_v17 = vmul.f32 %v1427_v16, %v1853_v56  ;;  %v1065_v18 = vmul.f32 %v1427_v16, %v1855_v24  ;;  %v1066_v12 = vmul.f32 %v1427_v16, %v1858_v51  ;;  %v1067_v10 = vmul.f32 %v1427_v16, %v1860_v1 }
 0x3e0   :  { %v1068_v19 = vmul.f32 %v1427_v16, %v1862_v32  ;;  %v1069_v20 = vmul.f32 %v1427_v16, %v1864_v2  ;;  %v1070_v21 = vmul.f32 %v1427_v16, %v1866_v3  ;;  %v1071_v22 = vmul.f32 %v1427_v16, %v1868_v4 }
 0x3e1   :  { %v1072_v56 = vmul.f32 %v1427_v16, %v1870_v6  ;;  %v1073_v24 = vmul.f32 %v1427_v16, %v1872_v5  ;;  %v1074_v51 = vmul.f32 %v1427_v16, %v1874_v36  ;;  %v1075_v1 = vmul.f32 %v1427_v16, %v1876_v0  ;;  %v1214_v36 = vld [vmem:[%s1954_s9] ss:$0 sm:$0xff]  ;;  %s1552_s9 = smov [#allocation10]  }
 0x3e2   :  { %v1076_v32 = vmul.f32 %v1427_v16, %v1878_v62  ;;  %v1077_v2 = vmul.f32 %v1427_v16, %v1880_v63  ;;  %v1078_v3 = vmul.f32 %v1427_v16, %v1882_v7  ;;  %v1079_v4 = vmul.f32 %v1427_v16, %v1884_v8  ;;  %s1163_s28 = sshll.u32 %s1552_s9, 4  ;;  %s1926_s28 = int_to_ptr.vmem [resolvable:$true] %s1163_s28 }
 0x3e3   :  { %v1087_v25 = vmul.f32 %v1213_v23, %v1064_v17  ;;  %v1088_v37 = vmul.f32 %v1213_v23, %v1065_v18  ;;  %v1089_v26 = vmul.f32 %v1213_v23, %v1066_v12  ;;  %v1090_v38 = vmul.f32 %v1213_v23, %v1067_v10  ;;  %s1516_s29 = scalar_lea.vmem %s1926_s28, 2048  ;;  %p1521_p5 = scmp.lt.s32.totalorder %s1926_s28, %s1926_s28 }
 0x3e4   :  { %v1091_v27 = vmul.f32 %v1213_v23, %v1068_v19  ;;  %v1092_v6 = vmul.f32 %v1213_v23, %v1069_v20  ;;  %v1093_v28 = vmul.f32 %v1213_v23, %v1070_v21  ;;  %v1094_v5 = vmul.f32 %v1213_v23, %v1071_v22  ;;  %p1517_p4 = scmp.ne.s32.totalorder %s1926_s28, %s1516_s29  ;;  %p1522_p6 = scmp.lt.s32.totalorder %s1516_s29, %s1516_s29 }
 0x3e5   :  { %v1095_v0 = vmul.f32 %v1213_v23, %v1072_v56  ;;  %v1096_v62 = vmul.f32 %v1213_v23, %v1073_v24  ;;  %v1097_v29 = vmul.f32 %v1213_v23, %v1074_v51  ;;  %v1098_v63 = vmul.f32 %v1213_v23, %v1075_v1 }
 0x3e6   :  { %v1099_v33 = vmul.f32 %v1213_v23, %v1076_v32  ;;  %v1100_v7 = vmul.f32 %v1213_v23, %v1077_v2  ;;  %v1101_v40 = vmul.f32 %v1213_v23, %v1078_v3  ;;  %v1102_v8 = vmul.f32 %v1213_v23, %v1079_v4  ;;  %p1523_p7 = por %p1522_p6, %p1521_p5 }
 0x3e7   :  { %v1110_v45 = vadd.f32 %v1214_v36, %v1087_v25  ;;  %v1111_v43 = vadd.f32 %v1214_v36, %v1088_v37  ;;  %v1112_v47 = vadd.f32 %v1214_v36, %v1089_v26  ;;  %v1113_v48 = vadd.f32 %v1214_v36, %v1090_v38 }
 0x3e8   :  { %v1114_v41 = vadd.f32 %v1214_v36, %v1091_v27  ;;  %v1115_v49 = vadd.f32 %v1214_v36, %v1092_v6  ;;  %v1116_v52 = vadd.f32 %v1214_v36, %v1093_v28  ;;  %v1117_v53 = vadd.f32 %v1214_v36, %v1094_v5  ;;  %p1524_p8 = pnand %p1523_p7, %p1517_p4 }
 0x3e9   :  { %v1118_v54 = vadd.f32 %v1214_v36, %v1095_v0  ;;  %v1119_v31 = vadd.f32 %v1214_v36, %v1096_v62  ;;  %v1120_v55 = vadd.f32 %v1214_v36, %v1097_v29  ;;  %v1121_v57 = vadd.f32 %v1214_v36, %v1098_v63 }
 0x3ea   :  { %v1122_v58 = vadd.f32 %v1214_v36, %v1099_v33  ;;  %v1123_v59 = vadd.f32 %v1214_v36, %v1100_v7  ;;  %v1124_v60 = vadd.f32 %v1214_v36, %v1101_v40  ;;  %v1125_v39 = vadd.f32 %v1214_v36, %v1102_v8 }
 0x3eb   :  { %v1126_v50 = vmax.f32 %v1110_v45, 0.0  ;;  %v1127_v44 = vmax.f32 %v1111_v43, 0.0  ;;  %v1128_v46 = vmax.f32 %v1112_v47, 0.0  ;;  %v1129_v34 = vmax.f32 %v1113_v48, 0.0 }
 0x3ec   :  { %v1130_v35 = vmax.f32 %v1114_v41, 0.0  ;;  %v1131_v61 = vmax.f32 %v1115_v49, 0.0  ;;  %v1132_v42 = vmax.f32 %v1116_v52, 0.0  ;;  %v1133_v30 = vmax.f32 %v1117_v53, 0.0 }
 0x3ed   :  { %v1134_v9 = vmax.f32 %v1118_v54, 0.0  ;;  %v1135_v11 = vmax.f32 %v1119_v31, 0.0  ;;  %v1136_v13 = vmax.f32 %v1120_v55, 0.0  ;;  %v1137_v14 = vmax.f32 %v1121_v57, 0.0  ;;  %1142 = vst [vmem:[#allocation10] sm:$0xff] %v1126_v50  ;;  %1143 = vst [vmem:[#allocation10 + $0x8] sm:$0xff] %v1127_v44 }
 0x3ee   :  { %1144 = vst [vmem:[#allocation10 + $0x10] sm:$0xff] %v1128_v46  ;;  %1145 = vst [vmem:[#allocation10 + $0x18] sm:$0xff] %v1129_v34  ;;  %v1138_v15 = vmax.f32 %v1122_v58, 0.0  ;;  %v1139_v16 = vmax.f32 %v1123_v59, 0.0  ;;  %v1140_v17 = vmax.f32 %v1124_v60, 0.0  ;;  %v1141_v18 = vmax.f32 %v1125_v39, 0.0 }
 0x3ef   :  { %1146 = vst [vmem:[#allocation10 + $0x20] sm:$0xff] %v1130_v35  ;;  %1147 = vst [vmem:[#allocation10 + $0x28] sm:$0xff] %v1131_v61 }
 0x3f0   :  { %1148 = vst [vmem:[#allocation10 + $0x30] sm:$0xff] %v1132_v42  ;;  %1149 = vst [vmem:[#allocation10 + $0x38] sm:$0xff] %v1133_v30 }
 0x3f1   :  { %1150 = vst [vmem:[#allocation10 + $0x40] sm:$0xff] %v1134_v9  ;;  %1151 = vst [vmem:[#allocation10 + $0x48] sm:$0xff] %v1135_v11 }
 0x3f2   :  { %1152 = vst [vmem:[#allocation10 + $0x50] sm:$0xff] %v1136_v13  ;;  %1153 = vst [vmem:[#allocation10 + $0x58] sm:$0xff] %v1137_v14 }
 0x3f3   :  { %1154 = vst [vmem:[#allocation10 + $0x60] sm:$0xff] %v1138_v15  ;;  %1155 = vst [vmem:[#allocation10 + $0x68] sm:$0xff] %v1139_v16 }
 0x3f4   :  { %1156 = vst [vmem:[#allocation10 + $0x70] sm:$0xff] %v1140_v17  ;;  %1157 = vst [vmem:[#allocation10 + $0x78] sm:$0xff] %v1141_v18 }
 0x3f5   :  { %1527 = shalt.err (!%p1524_p8)
}
 0x3f6   :  { %s1528_s0 = scalar_lea.hbm %s1955_s10, 2048 }
 0x3f7   :  { %p1529_p9 = scmp.ne.s32.totalorder %s1955_s10, %s1528_s0  ;;  %p1532_p10 = scmp.lt.u32.totalorder %s1528_s0, %s1955_s10 }
 0x3f9   :  { %p1534_p11 = pnand %p1532_p10, %p1529_p9 }
 0x3fb   :  { %1537 = shalt.err (!%p1534_p11)
}
 0x3fc   :  { %s1553_s17 = smov 128   ;;  %s1554_s18 = smov 8  }
 0x3fd   :  { %1169 = dma.vmem_to_hbm [thread:$0]  %s1926_s28, 2048, %s1955_s10, [#allocation4], %s1553_s17, %s1553_s17, %s1554_s18  }
 0x3fe   :  { %1544 = dma.done.wait [#allocation4], 2048  }
 0x3ff   :  { %1545 = vsyncadd [#allocation4], 4294965248 }
 0x400   :  { %1173 = vsyncpa [#allocation3], 1 }
 0x401   :  { %1174 = vsyncpa [#allocation6], 1 }
 0x402   :  { %1175 = vsyncpa [#allocation9], 1 }
 0x403   :  { %1176 = vsyncpa [#allocation4], 1 }

</bundles_post_ra>
